<compile_context>
chip_gen: v7x
topology: tpu7x:2x2x1
jax: 0.10.0
libtpu: 0.0.40
codegen_flags: <defaults>
</compile_context>

<pallas_src>
import math

import jax
import jax.numpy as jnp
from jax import lax
from jax.experimental import pallas as pl
from jax.experimental.pallas import tpu as pltpu

# ------------------------- model hyper-parameters --------------------------
DT = 0.001
TAU_MEM = 0.005      # flif_kwargs V_tau_mean default
TAU_SYN = 0.002      # flif_kwargs I_tau_mean default
TAU_MEM_RO = 0.005   # readout_kwargs V_tau_mean default
TAU_SYN_RO = 0.002   # readout_kwargs I_tau_mean default
NU = 50.0

DCY_MEM = math.exp(-DT / TAU_MEM)
SCL_MEM = 1.0 - DCY_MEM
DCY_SYN = math.exp(-DT / TAU_SYN)
DCY_MEM_RO = math.exp(-DT / TAU_MEM_RO)
SCL_MEM_RO = 1.0 - DCY_MEM_RO
DCY_SYN_RO = math.exp(-DT / TAU_SYN_RO)
THRESHOLD = 1.0

LANE = 128     # vreg lane width    -> pad last dims to multiples of this
SUBLANE = 8    # vreg sublane rows  -> pad batch to a multiple of this


def _round_up(n: int, m: int) -> int:
    return ((n + m - 1) // m) * m


# ------------------------------ Pallas kernel ------------------------------
def rsnn_kernel(x_ref, w1_ref, b1_ref, w2_ref, b2_ref, o_ref, ff_ref):
    """Whole-sequence SNN simulation in a single kernel invocation.

    Phase 1: one MXU matmul  FF = x @ W1 + b1   over all T*B rows.
    Phase 2: serial hidden FastLIF loop — pure VPU; spikes overwrite ff_ref
             in place (each slot is read before it is overwritten).
    Phase 3: one MXU matmul  R = spikes @ W2 + b2 over all T*B rows, written
             straight into the lane-dense output slab.
    Phase 4: serial FastReadout leaky-integrator loop — pure VPU; o_ref[t]
             (holding R[t]) is read, then overwritten with the readout mem.
    """
    T, Bp, Dinp = x_ref.shape
    Hp = w1_ref.shape[1]
    Pp = w2_ref.shape[1]

    # ---- phase 1: hoisted, state-independent input projection --------------
    x2d = x_ref[...].reshape(T * Bp, Dinp)
    ff = jnp.dot(x2d, w1_ref[...], preferred_element_type=jnp.float32)
    ff_ref[...] = (ff + b1_ref[...]).reshape(T, Bp, Hp)

    # ---- phase 2: hidden FastLIFGroup (reset='sub'), elementwise-only ------
    def lif_body(t, carry):
        syn1, mem1 = carry
        ff_t = ff_ref[t]                                   # (Bp, Hp)
        new_syn1 = DCY_SYN * syn1 + ff_t
        new_mem1 = DCY_MEM * mem1 + SCL_MEM * syn1         # pre-update syn
        spk = (new_mem1 - THRESHOLD > 0.0).astype(jnp.float32)
        ff_ref[t] = spk                                    # reuse scratch slot
        return new_syn1, new_mem1 - spk * THRESHOLD        # subtractive reset

    zeros_h = jnp.zeros((Bp, Hp), jnp.float32)
    _ = lax.fori_loop(0, T, lif_body, (zeros_h, zeros_h), unroll=True)

    # ---- phase 3: hoisted readout-pool projection over all spikes ----------
    spk2d = ff_ref[...].reshape(T * Bp, Hp)
    r = jnp.dot(spk2d, w2_ref[...], preferred_element_type=jnp.float32)
    o_ref[...] = (r + b2_ref[...]).reshape(T, Bp, Pp)

    # ---- phase 4: FastReadoutGroup leaky integrator, elementwise-only ------
    # (average connection to DirectReadoutGroup is identity for n_readouts=1)
    def ro_body(t, carry):
        syn2, mem2 = carry
        r_t = o_ref[t]                                     # read R[t] ...
        new_syn2 = DCY_SYN_RO * syn2 + r_t
        new_mem2 = DCY_MEM_RO * mem2 + SCL_MEM_RO * syn2   # pre-update syn
        o_ref[t] = new_mem2                                # ... then overwrite
        return new_syn2, new_mem2

    zeros_p = jnp.zeros((Bp, Pp), jnp.float32)
    _ = lax.fori_loop(0, T, ro_body, (zeros_p, zeros_p), unroll=True)


# --------------------------------- wrapper ----------------------------------
def rsnn_forward(state, action, w1, b1, w2, b2):
    """TransitionNet forward: state (T,B,Ds), action (T,B,Da) -> (T,B,Ds)."""
    x = jnp.concatenate([state, action], axis=-1).astype(jnp.float32)
    T, B, Din = x.shape
    H = w1.shape[1]
    P = w2.shape[1]          # = output_dim * n_readouts (n_readouts = 1)
    Dout = P

    Bp = _round_up(B, SUBLANE)
    Dinp = _round_up(Din, LANE)
    Hp = _round_up(H, LANE)
    Pp = _round_up(P, LANE)

    # Zero-pad to lane/sublane-dense tiles. Padded hidden units get zero
    # weights and bias, so they never spike; padded batch rows / output
    # columns are sliced away below -> real results are exact.
    xp = jnp.zeros((T, Bp, Dinp), jnp.float32).at[:, :B, :Din].set(x)
    w1p = jnp.zeros((Dinp, Hp), jnp.float32).at[:Din, :H].set(w1)
    b1p = jnp.zeros((1, Hp), jnp.float32).at[:, :H].set(b1)
    w2p = jnp.zeros((Hp, Pp), jnp.float32).at[:H, :P].set(w2)
    b2p = jnp.zeros((1, Pp), jnp.float32).at[:, :P].set(b2)

    vmem_spec = pl.BlockSpec(memory_space=pltpu.MemorySpace.VMEM)
    out = pl.pallas_call(
        rsnn_kernel,
        out_shape=jax.ShapeDtypeStruct((T, Bp, Pp), jnp.float32),
        in_specs=[vmem_spec] * 5,            # whole arrays resident in VMEM
        out_specs=vmem_spec,                 # lane-dense (T, Bp, 128) slab
        scratch_shapes=[pltpu.VMEM((T, Bp, Hp), jnp.float32)],  # FF / spikes
        compiler_params=pltpu.CompilerParams(vmem_limit_bytes=32 * 1024 * 1024),
    )(xp, w1p, b1p, w2p, b2p)

    return out[:, :B, :Dout]


# --------------------------- pure-JAX reference -----------------------------
def rsnn_reference(x, w1, b1, w2, b2):
    T, B, _ = x.shape
    H, P = w1.shape[1], w2.shape[1]
    syn1 = jnp.zeros((B, H)); mem1 = jnp.zeros((B, H))
    syn2 = jnp.zeros((B, P)); mem2 = jnp.zeros((B, P))
    outs = []
    for t in range(T):
        ff = x[t] @ w1 + b1
        new_syn1 = DCY_SYN * syn1 + ff
        new_mem1 = DCY_MEM * mem1 + SCL_MEM * syn1
        spk = (new_mem1 - THRESHOLD > 0.0).astype(jnp.float32)
        mem1 = new_mem1 - spk * THRESHOLD
        syn1 = new_syn1
        ro = spk @ w2 + b2
        syn2, mem2 = DCY_SYN_RO * syn2 + ro, DCY_MEM_RO * mem2 + SCL_MEM_RO * syn2
        outs.append(mem2)   # n_readouts=1 -> average connection is identity
    return jnp.stack(outs, axis=0)


# --------------------------------- driver -----------------------------------
if __name__ == "__main__":
    # TransitionNet: input_dim = state_dim + action_dim, output_dim = state_dim.
    # Small shapes: seq T=8, batch B=4, state_dim=8, action_dim=8, hidden=32.
    T, B = 8, 4
    STATE_DIM, ACTION_DIM, HIDDEN_DIM, N_READOUTS = 8, 8, 32, 1
    INPUT_DIM = STATE_DIM + ACTION_DIM
    OUTPUT_DIM = STATE_DIM
    P = OUTPUT_DIM * N_READOUTS

    key = jax.random.PRNGKey(0)
    ks, ka, kw1, kw2 = jax.random.split(key, 4)

    # time-major inputs (T, B, D), as in the PyTorch forward
    state = jax.random.normal(ks, (T, B, STATE_DIM), dtype=jnp.float32) * 2.0
    action = jax.random.normal(ka, (T, B, ACTION_DIM), dtype=jnp.float32) * 2.0

    # Fluctuation-driven centered-normal-style init: sigma ~ 1/sqrt(nu*dt*fan_in)
    def fd_init(k, fan_in, fan_out):
        sigma = 1.0 / math.sqrt(max(NU * DT * fan_in, 1e-6))
        return (sigma * jax.random.normal(k, (fan_in, fan_out))).astype(jnp.float32)

    w1 = fd_init(kw1, INPUT_DIM, HIDDEN_DIM)
    b1 = jnp.zeros((1, HIDDEN_DIM), dtype=jnp.float32)
    w2 = fd_init(kw2, HIDDEN_DIM, P)
    b2 = jnp.zeros((1, P), dtype=jnp.float32)

    out = rsnn_forward(state, action, w1, b1, w2, b2)
    out = jax.block_until_ready(out)

    ref = rsnn_reference(jnp.concatenate([state, action], axis=-1),
                         w1, b1, w2, b2)
    assert out.shape == (T, B, OUTPUT_DIM)
    assert jnp.allclose(out, ref, atol=1e-5, rtol=1e-5)

    print("KERNEL_OK")
</pallas_src>

<mosaic_0001>
module attributes {stable_mosaic.version = 11 : i64} {
  func.func @rsnn_kernel(%arg0: memref<8x8x128xf32, #tpu.memory_space<vmem>>, %arg1: memref<128x128xf32, #tpu.memory_space<vmem>>, %arg2: memref<1x128xf32, #tpu.memory_space<vmem>>, %arg3: memref<128x128xf32, #tpu.memory_space<vmem>>, %arg4: memref<1x128xf32, #tpu.memory_space<vmem>>, %arg5: memref<8x8x128xf32, #tpu.memory_space<vmem>>, %arg6: memref<8x8x128xf32, #tpu.memory_space<vmem>>) attributes {dimension_semantics = [], scalar_prefetch = 0 : i64, scratch_operands = 1 : i64, tpu.core_type = #tpu.core_type<tc>} {
    %c0 = arith.constant 0 : index
    %c0_0 = arith.constant 0 : index
    %c0_1 = arith.constant 0 : index
    %0 = vector.load %arg0[%c0, %c0_0, %c0_1] : memref<8x8x128xf32, #tpu.memory_space<vmem>>, vector<8x8x128xf32>
    %1 = vector.shape_cast %0 : vector<8x8x128xf32> to vector<64x128xf32>
    %c0_2 = arith.constant 0 : index
    %c0_3 = arith.constant 0 : index
    %2 = vector.load %arg1[%c0_2, %c0_3] : memref<128x128xf32, #tpu.memory_space<vmem>>, vector<128x128xf32>
    %cst = arith.constant dense<0.000000e+00> : vector<64x128xf32>
    %3 = tpu.matmul %1, %2, %cst {dimension_numbers = #tpu.dot_dimension_numbers<[1], [0], [0], [1], [0, 0, 1, 1], [], []>} : vector<64x128xf32>, vector<128x128xf32>, vector<64x128xf32> -> vector<64x128xf32>
    %c0_4 = arith.constant 0 : index
    %c0_5 = arith.constant 0 : index
    %4 = vector.load %arg2[%c0_4, %c0_5] : memref<1x128xf32, #tpu.memory_space<vmem>>, vector<1x128xf32>
    %5 = vector.broadcast %4 : vector<1x128xf32> to vector<64x128xf32>
    %6 = arith.addf %3, %5 : vector<64x128xf32>
    %7 = vector.shape_cast %6 : vector<64x128xf32> to vector<8x8x128xf32>
    %c0_6 = arith.constant 0 : index
    %c0_7 = arith.constant 0 : index
    %c0_8 = arith.constant 0 : index
    %8 = vector.load %arg6[%c0_6, %c0_7, %c0_8] : memref<8x8x128xf32, #tpu.memory_space<vmem>>, vector<8x8x128xf32>
    tpu.vector_store %arg6[%c0_6, %c0_7, %c0_8], %7 {strides = array<i32>} : memref<8x8x128xf32, #tpu.memory_space<vmem>>, vector<8x8x128xf32>,
    %cst_9 = arith.constant 0.000000e+00 : f32
    %9 = vector.broadcast %cst_9 : f32 to vector<8x128xf32>
    %c0_i32 = arith.constant 0 : i32
    %10 = arith.index_cast %c0_i32 : i32 to index
    %c0_10 = arith.constant 0 : index
    %c0_11 = arith.constant 0 : index
    %11 = vector.load %arg6[%10, %c0_10, %c0_11] : memref<8x8x128xf32, #tpu.memory_space<vmem>>, vector<1x8x128xf32>
    %12 = vector.shape_cast %11 : vector<1x8x128xf32> to vector<8x128xf32>
    %cst_12 = arith.constant 0.606530666 : f32
    %13 = vector.broadcast %cst_12 : f32 to vector<8x128xf32>
    %14 = arith.mulf %13, %9 : vector<8x128xf32>
    %15 = arith.addf %14, %12 : vector<8x128xf32>
    %cst_13 = arith.constant 0.818730771 : f32
    %16 = vector.broadcast %cst_13 : f32 to vector<8x128xf32>
    %17 = arith.mulf %16, %9 : vector<8x128xf32>
    %cst_14 = arith.constant 0.181269243 : f32
    %18 = vector.broadcast %cst_14 : f32 to vector<8x128xf32>
    %19 = arith.mulf %18, %9 : vector<8x128xf32>
    %20 = arith.addf %17, %19 : vector<8x128xf32>
    %cst_15 = arith.constant 1.000000e+00 : f32
    %21 = vector.broadcast %cst_15 : f32 to vector<8x128xf32>
    %22 = arith.subf %20, %21 : vector<8x128xf32>
    %cst_16 = arith.constant 0.000000e+00 : f32
    %23 = vector.broadcast %cst_16 : f32 to vector<8x128xf32>
    %24 = arith.cmpf ogt, %22, %23 : vector<8x128xf32>
    %25 = arith.extui %24 : vector<8x128xi1> to vector<8x128xi32>
    %26 = arith.sitofp %25 : vector<8x128xi32> to vector<8x128xf32>
    %27 = arith.index_cast %c0_i32 : i32 to index
    %c0_17 = arith.constant 0 : index
    %c0_18 = arith.constant 0 : index
    %28 = vector.load %arg6[%27, %c0_17, %c0_18] : memref<8x8x128xf32, #tpu.memory_space<vmem>>, vector<1x8x128xf32>
    %29 = vector.shape_cast %28 : vector<1x8x128xf32> to vector<8x128xf32>
    %30 = vector.shape_cast %26 : vector<8x128xf32> to vector<1x8x128xf32>
    tpu.vector_store %arg6[%27, %c0_17, %c0_18], %30 {strides = array<i32>} : memref<8x8x128xf32, #tpu.memory_space<vmem>>, vector<1x8x128xf32>,
    %cst_19 = arith.constant 1.000000e+00 : f32
    %31 = vector.broadcast %cst_19 : f32 to vector<8x128xf32>
    %32 = arith.mulf %26, %31 : vector<8x128xf32>
    %33 = arith.subf %20, %32 : vector<8x128xf32>
    %c1_i32 = arith.constant 1 : i32
    %34 = arith.index_cast %c1_i32 : i32 to index
    %c0_20 = arith.constant 0 : index
    %c0_21 = arith.constant 0 : index
    %35 = vector.load %arg6[%34, %c0_20, %c0_21] : memref<8x8x128xf32, #tpu.memory_space<vmem>>, vector<1x8x128xf32>
    %36 = vector.shape_cast %35 : vector<1x8x128xf32> to vector<8x128xf32>
    %cst_22 = arith.constant 0.606530666 : f32
    %37 = vector.broadcast %cst_22 : f32 to vector<8x128xf32>
    %38 = arith.mulf %37, %15 : vector<8x128xf32>
    %39 = arith.addf %38, %36 : vector<8x128xf32>
    %cst_23 = arith.constant 0.818730771 : f32
    %40 = vector.broadcast %cst_23 : f32 to vector<8x128xf32>
    %41 = arith.mulf %40, %33 : vector<8x128xf32>
    %cst_24 = arith.constant 0.181269243 : f32
    %42 = vector.broadcast %cst_24 : f32 to vector<8x128xf32>
    %43 = arith.mulf %42, %15 : vector<8x128xf32>
    %44 = arith.addf %41, %43 : vector<8x128xf32>
    %cst_25 = arith.constant 1.000000e+00 : f32
    %45 = vector.broadcast %cst_25 : f32 to vector<8x128xf32>
    %46 = arith.subf %44, %45 : vector<8x128xf32>
    %cst_26 = arith.constant 0.000000e+00 : f32
    %47 = vector.broadcast %cst_26 : f32 to vector<8x128xf32>
    %48 = arith.cmpf ogt, %46, %47 : vector<8x128xf32>
    %49 = arith.extui %48 : vector<8x128xi1> to vector<8x128xi32>
    %50 = arith.sitofp %49 : vector<8x128xi32> to vector<8x128xf32>
    %51 = arith.index_cast %c1_i32 : i32 to index
    %c0_27 = arith.constant 0 : index
    %c0_28 = arith.constant 0 : index
    %52 = vector.load %arg6[%51, %c0_27, %c0_28] : memref<8x8x128xf32, #tpu.memory_space<vmem>>, vector<1x8x128xf32>
    %53 = vector.shape_cast %52 : vector<1x8x128xf32> to vector<8x128xf32>
    %54 = vector.shape_cast %50 : vector<8x128xf32> to vector<1x8x128xf32>
    tpu.vector_store %arg6[%51, %c0_27, %c0_28], %54 {strides = array<i32>} : memref<8x8x128xf32, #tpu.memory_space<vmem>>, vector<1x8x128xf32>,
    %cst_29 = arith.constant 1.000000e+00 : f32
    %55 = vector.broadcast %cst_29 : f32 to vector<8x128xf32>
    %56 = arith.mulf %50, %55 : vector<8x128xf32>
    %57 = arith.subf %44, %56 : vector<8x128xf32>
    %c2_i32 = arith.constant 2 : i32
    %58 = arith.index_cast %c2_i32 : i32 to index
    %c0_30 = arith.constant 0 : index
    %c0_31 = arith.constant 0 : index
    %59 = vector.load %arg6[%58, %c0_30, %c0_31] : memref<8x8x128xf32, #tpu.memory_space<vmem>>, vector<1x8x128xf32>
    %60 = vector.shape_cast %59 : vector<1x8x128xf32> to vector<8x128xf32>
    %cst_32 = arith.constant 0.606530666 : f32
    %61 = vector.broadcast %cst_32 : f32 to vector<8x128xf32>
    %62 = arith.mulf %61, %39 : vector<8x128xf32>
    %63 = arith.addf %62, %60 : vector<8x128xf32>
    %cst_33 = arith.constant 0.818730771 : f32
    %64 = vector.broadcast %cst_33 : f32 to vector<8x128xf32>
    %65 = arith.mulf %64, %57 : vector<8x128xf32>
    %cst_34 = arith.constant 0.181269243 : f32
    %66 = vector.broadcast %cst_34 : f32 to vector<8x128xf32>
    %67 = arith.mulf %66, %39 : vector<8x128xf32>
    %68 = arith.addf %65, %67 : vector<8x128xf32>
    %cst_35 = arith.constant 1.000000e+00 : f32
    %69 = vector.broadcast %cst_35 : f32 to vector<8x128xf32>
    %70 = arith.subf %68, %69 : vector<8x128xf32>
    %cst_36 = arith.constant 0.000000e+00 : f32
    %71 = vector.broadcast %cst_36 : f32 to vector<8x128xf32>
    %72 = arith.cmpf ogt, %70, %71 : vector<8x128xf32>
    %73 = arith.extui %72 : vector<8x128xi1> to vector<8x128xi32>
    %74 = arith.sitofp %73 : vector<8x128xi32> to vector<8x128xf32>
    %75 = arith.index_cast %c2_i32 : i32 to index
    %c0_37 = arith.constant 0 : index
    %c0_38 = arith.constant 0 : index
    %76 = vector.load %arg6[%75, %c0_37, %c0_38] : memref<8x8x128xf32, #tpu.memory_space<vmem>>, vector<1x8x128xf32>
    %77 = vector.shape_cast %76 : vector<1x8x128xf32> to vector<8x128xf32>
    %78 = vector.shape_cast %74 : vector<8x128xf32> to vector<1x8x128xf32>
    tpu.vector_store %arg6[%75, %c0_37, %c0_38], %78 {strides = array<i32>} : memref<8x8x128xf32, #tpu.memory_space<vmem>>, vector<1x8x128xf32>,
    %cst_39 = arith.constant 1.000000e+00 : f32
    %79 = vector.broadcast %cst_39 : f32 to vector<8x128xf32>
    %80 = arith.mulf %74, %79 : vector<8x128xf32>
    %81 = arith.subf %68, %80 : vector<8x128xf32>
    %c3_i32 = arith.constant 3 : i32
    %82 = arith.index_cast %c3_i32 : i32 to index
    %c0_40 = arith.constant 0 : index
    %c0_41 = arith.constant 0 : index
    %83 = vector.load %arg6[%82, %c0_40, %c0_41] : memref<8x8x128xf32, #tpu.memory_space<vmem>>, vector<1x8x128xf32>
    %84 = vector.shape_cast %83 : vector<1x8x128xf32> to vector<8x128xf32>
    %cst_42 = arith.constant 0.606530666 : f32
    %85 = vector.broadcast %cst_42 : f32 to vector<8x128xf32>
    %86 = arith.mulf %85, %63 : vector<8x128xf32>
    %87 = arith.addf %86, %84 : vector<8x128xf32>
    %cst_43 = arith.constant 0.818730771 : f32
    %88 = vector.broadcast %cst_43 : f32 to vector<8x128xf32>
    %89 = arith.mulf %88, %81 : vector<8x128xf32>
    %cst_44 = arith.constant 0.181269243 : f32
    %90 = vector.broadcast %cst_44 : f32 to vector<8x128xf32>
    %91 = arith.mulf %90, %63 : vector<8x128xf32>
    %92 = arith.addf %89, %91 : vector<8x128xf32>
    %cst_45 = arith.constant 1.000000e+00 : f32
    %93 = vector.broadcast %cst_45 : f32 to vector<8x128xf32>
    %94 = arith.subf %92, %93 : vector<8x128xf32>
    %cst_46 = arith.constant 0.000000e+00 : f32
    %95 = vector.broadcast %cst_46 : f32 to vector<8x128xf32>
    %96 = arith.cmpf ogt, %94, %95 : vector<8x128xf32>
    %97 = arith.extui %96 : vector<8x128xi1> to vector<8x128xi32>
    %98 = arith.sitofp %97 : vector<8x128xi32> to vector<8x128xf32>
    %99 = arith.index_cast %c3_i32 : i32 to index
    %c0_47 = arith.constant 0 : index
    %c0_48 = arith.constant 0 : index
    %100 = vector.load %arg6[%99, %c0_47, %c0_48] : memref<8x8x128xf32, #tpu.memory_space<vmem>>, vector<1x8x128xf32>
    %101 = vector.shape_cast %100 : vector<1x8x128xf32> to vector<8x128xf32>
    %102 = vector.shape_cast %98 : vector<8x128xf32> to vector<1x8x128xf32>
    tpu.vector_store %arg6[%99, %c0_47, %c0_48], %102 {strides = array<i32>} : memref<8x8x128xf32, #tpu.memory_space<vmem>>, vector<1x8x128xf32>,
    %cst_49 = arith.constant 1.000000e+00 : f32
    %103 = vector.broadcast %cst_49 : f32 to vector<8x128xf32>
    %104 = arith.mulf %98, %103 : vector<8x128xf32>
    %105 = arith.subf %92, %104 : vector<8x128xf32>
    %c4_i32 = arith.constant 4 : i32
    %106 = arith.index_cast %c4_i32 : i32 to index
    %c0_50 = arith.constant 0 : index
    %c0_51 = arith.constant 0 : index
    %107 = vector.load %arg6[%106, %c0_50, %c0_51] : memref<8x8x128xf32, #tpu.memory_space<vmem>>, vector<1x8x128xf32>
    %108 = vector.shape_cast %107 : vector<1x8x128xf32> to vector<8x128xf32>
    %cst_52 = arith.constant 0.606530666 : f32
    %109 = vector.broadcast %cst_52 : f32 to vector<8x128xf32>
    %110 = arith.mulf %109, %87 : vector<8x128xf32>
    %111 = arith.addf %110, %108 : vector<8x128xf32>
    %cst_53 = arith.constant 0.818730771 : f32
    %112 = vector.broadcast %cst_53 : f32 to vector<8x128xf32>
    %113 = arith.mulf %112, %105 : vector<8x128xf32>
    %cst_54 = arith.constant 0.181269243 : f32
    %114 = vector.broadcast %cst_54 : f32 to vector<8x128xf32>
    %115 = arith.mulf %114, %87 : vector<8x128xf32>
    %116 = arith.addf %113, %115 : vector<8x128xf32>
    %cst_55 = arith.constant 1.000000e+00 : f32
    %117 = vector.broadcast %cst_55 : f32 to vector<8x128xf32>
    %118 = arith.subf %116, %117 : vector<8x128xf32>
    %cst_56 = arith.constant 0.000000e+00 : f32
    %119 = vector.broadcast %cst_56 : f32 to vector<8x128xf32>
    %120 = arith.cmpf ogt, %118, %119 : vector<8x128xf32>
    %121 = arith.extui %120 : vector<8x128xi1> to vector<8x128xi32>
    %122 = arith.sitofp %121 : vector<8x128xi32> to vector<8x128xf32>
    %123 = arith.index_cast %c4_i32 : i32 to index
    %c0_57 = arith.constant 0 : index
    %c0_58 = arith.constant 0 : index
    %124 = vector.load %arg6[%123, %c0_57, %c0_58] : memref<8x8x128xf32, #tpu.memory_space<vmem>>, vector<1x8x128xf32>
    %125 = vector.shape_cast %124 : vector<1x8x128xf32> to vector<8x128xf32>
    %126 = vector.shape_cast %122 : vector<8x128xf32> to vector<1x8x128xf32>
    tpu.vector_store %arg6[%123, %c0_57, %c0_58], %126 {strides = array<i32>} : memref<8x8x128xf32, #tpu.memory_space<vmem>>, vector<1x8x128xf32>,
    %cst_59 = arith.constant 1.000000e+00 : f32
    %127 = vector.broadcast %cst_59 : f32 to vector<8x128xf32>
    %128 = arith.mulf %122, %127 : vector<8x128xf32>
    %129 = arith.subf %116, %128 : vector<8x128xf32>
    %c5_i32 = arith.constant 5 : i32
    %130 = arith.index_cast %c5_i32 : i32 to index
    %c0_60 = arith.constant 0 : index
    %c0_61 = arith.constant 0 : index
    %131 = vector.load %arg6[%130, %c0_60, %c0_61] : memref<8x8x128xf32, #tpu.memory_space<vmem>>, vector<1x8x128xf32>
    %132 = vector.shape_cast %131 : vector<1x8x128xf32> to vector<8x128xf32>
    %cst_62 = arith.constant 0.606530666 : f32
    %133 = vector.broadcast %cst_62 : f32 to vector<8x128xf32>
    %134 = arith.mulf %133, %111 : vector<8x128xf32>
    %135 = arith.addf %134, %132 : vector<8x128xf32>
    %cst_63 = arith.constant 0.818730771 : f32
    %136 = vector.broadcast %cst_63 : f32 to vector<8x128xf32>
    %137 = arith.mulf %136, %129 : vector<8x128xf32>
    %cst_64 = arith.constant 0.181269243 : f32
    %138 = vector.broadcast %cst_64 : f32 to vector<8x128xf32>
    %139 = arith.mulf %138, %111 : vector<8x128xf32>
    %140 = arith.addf %137, %139 : vector<8x128xf32>
    %cst_65 = arith.constant 1.000000e+00 : f32
    %141 = vector.broadcast %cst_65 : f32 to vector<8x128xf32>
    %142 = arith.subf %140, %141 : vector<8x128xf32>
    %cst_66 = arith.constant 0.000000e+00 : f32
    %143 = vector.broadcast %cst_66 : f32 to vector<8x128xf32>
    %144 = arith.cmpf ogt, %142, %143 : vector<8x128xf32>
    %145 = arith.extui %144 : vector<8x128xi1> to vector<8x128xi32>
    %146 = arith.sitofp %145 : vector<8x128xi32> to vector<8x128xf32>
    %147 = arith.index_cast %c5_i32 : i32 to index
    %c0_67 = arith.constant 0 : index
    %c0_68 = arith.constant 0 : index
    %148 = vector.load %arg6[%147, %c0_67, %c0_68] : memref<8x8x128xf32, #tpu.memory_space<vmem>>, vector<1x8x128xf32>
    %149 = vector.shape_cast %148 : vector<1x8x128xf32> to vector<8x128xf32>
    %150 = vector.shape_cast %146 : vector<8x128xf32> to vector<1x8x128xf32>
    tpu.vector_store %arg6[%147, %c0_67, %c0_68], %150 {strides = array<i32>} : memref<8x8x128xf32, #tpu.memory_space<vmem>>, vector<1x8x128xf32>,
    %cst_69 = arith.constant 1.000000e+00 : f32
    %151 = vector.broadcast %cst_69 : f32 to vector<8x128xf32>
    %152 = arith.mulf %146, %151 : vector<8x128xf32>
    %153 = arith.subf %140, %152 : vector<8x128xf32>
    %c6_i32 = arith.constant 6 : i32
    %154 = arith.index_cast %c6_i32 : i32 to index
    %c0_70 = arith.constant 0 : index
    %c0_71 = arith.constant 0 : index
    %155 = vector.load %arg6[%154, %c0_70, %c0_71] : memref<8x8x128xf32, #tpu.memory_space<vmem>>, vector<1x8x128xf32>
    %156 = vector.shape_cast %155 : vector<1x8x128xf32> to vector<8x128xf32>
    %cst_72 = arith.constant 0.606530666 : f32
    %157 = vector.broadcast %cst_72 : f32 to vector<8x128xf32>
    %158 = arith.mulf %157, %135 : vector<8x128xf32>
    %159 = arith.addf %158, %156 : vector<8x128xf32>
    %cst_73 = arith.constant 0.818730771 : f32
    %160 = vector.broadcast %cst_73 : f32 to vector<8x128xf32>
    %161 = arith.mulf %160, %153 : vector<8x128xf32>
    %cst_74 = arith.constant 0.181269243 : f32
    %162 = vector.broadcast %cst_74 : f32 to vector<8x128xf32>
    %163 = arith.mulf %162, %135 : vector<8x128xf32>
    %164 = arith.addf %161, %163 : vector<8x128xf32>
    %cst_75 = arith.constant 1.000000e+00 : f32
    %165 = vector.broadcast %cst_75 : f32 to vector<8x128xf32>
    %166 = arith.subf %164, %165 : vector<8x128xf32>
    %cst_76 = arith.constant 0.000000e+00 : f32
    %167 = vector.broadcast %cst_76 : f32 to vector<8x128xf32>
    %168 = arith.cmpf ogt, %166, %167 : vector<8x128xf32>
    %169 = arith.extui %168 : vector<8x128xi1> to vector<8x128xi32>
    %170 = arith.sitofp %169 : vector<8x128xi32> to vector<8x128xf32>
    %171 = arith.index_cast %c6_i32 : i32 to index
    %c0_77 = arith.constant 0 : index
    %c0_78 = arith.constant 0 : index
    %172 = vector.load %arg6[%171, %c0_77, %c0_78] : memref<8x8x128xf32, #tpu.memory_space<vmem>>, vector<1x8x128xf32>
    %173 = vector.shape_cast %172 : vector<1x8x128xf32> to vector<8x128xf32>
    %174 = vector.shape_cast %170 : vector<8x128xf32> to vector<1x8x128xf32>
    tpu.vector_store %arg6[%171, %c0_77, %c0_78], %174 {strides = array<i32>} : memref<8x8x128xf32, #tpu.memory_space<vmem>>, vector<1x8x128xf32>,
    %cst_79 = arith.constant 1.000000e+00 : f32
    %175 = vector.broadcast %cst_79 : f32 to vector<8x128xf32>
    %176 = arith.mulf %170, %175 : vector<8x128xf32>
    %177 = arith.subf %164, %176 : vector<8x128xf32>
    %c7_i32 = arith.constant 7 : i32
    %178 = arith.index_cast %c7_i32 : i32 to index
    %c0_80 = arith.constant 0 : index
    %c0_81 = arith.constant 0 : index
    %179 = vector.load %arg6[%178, %c0_80, %c0_81] : memref<8x8x128xf32, #tpu.memory_space<vmem>>, vector<1x8x128xf32>
    %180 = vector.shape_cast %179 : vector<1x8x128xf32> to vector<8x128xf32>
    %cst_82 = arith.constant 0.606530666 : f32
    %181 = vector.broadcast %cst_82 : f32 to vector<8x128xf32>
    %182 = arith.mulf %181, %159 : vector<8x128xf32>
    %183 = arith.addf %182, %180 : vector<8x128xf32>
    %cst_83 = arith.constant 0.818730771 : f32
    %184 = vector.broadcast %cst_83 : f32 to vector<8x128xf32>
    %185 = arith.mulf %184, %177 : vector<8x128xf32>
    %cst_84 = arith.constant 0.181269243 : f32
    %186 = vector.broadcast %cst_84 : f32 to vector<8x128xf32>
    %187 = arith.mulf %186, %159 : vector<8x128xf32>
    %188 = arith.addf %185, %187 : vector<8x128xf32>
    %cst_85 = arith.constant 1.000000e+00 : f32
    %189 = vector.broadcast %cst_85 : f32 to vector<8x128xf32>
    %190 = arith.subf %188, %189 : vector<8x128xf32>
    %cst_86 = arith.constant 0.000000e+00 : f32
    %191 = vector.broadcast %cst_86 : f32 to vector<8x128xf32>
    %192 = arith.cmpf ogt, %190, %191 : vector<8x128xf32>
    %193 = arith.extui %192 : vector<8x128xi1> to vector<8x128xi32>
    %194 = arith.sitofp %193 : vector<8x128xi32> to vector<8x128xf32>
    %195 = arith.index_cast %c7_i32 : i32 to index
    %c0_87 = arith.constant 0 : index
    %c0_88 = arith.constant 0 : index
    %196 = vector.load %arg6[%195, %c0_87, %c0_88] : memref<8x8x128xf32, #tpu.memory_space<vmem>>, vector<1x8x128xf32>
    %197 = vector.shape_cast %196 : vector<1x8x128xf32> to vector<8x128xf32>
    %198 = vector.shape_cast %194 : vector<8x128xf32> to vector<1x8x128xf32>
    tpu.vector_store %arg6[%195, %c0_87, %c0_88], %198 {strides = array<i32>} : memref<8x8x128xf32, #tpu.memory_space<vmem>>, vector<1x8x128xf32>,
    %cst_89 = arith.constant 1.000000e+00 : f32
    %199 = vector.broadcast %cst_89 : f32 to vector<8x128xf32>
    %200 = arith.mulf %194, %199 : vector<8x128xf32>
    %201 = arith.subf %188, %200 : vector<8x128xf32>
    %c8_i32 = arith.constant 8 : i32
    %c0_90 = arith.constant 0 : index
    %c0_91 = arith.constant 0 : index
    %c0_92 = arith.constant 0 : index
    %202 = vector.load %arg6[%c0_90, %c0_91, %c0_92] : memref<8x8x128xf32, #tpu.memory_space<vmem>>, vector<8x8x128xf32>
    %203 = vector.shape_cast %202 : vector<8x8x128xf32> to vector<64x128xf32>
    %c0_93 = arith.constant 0 : index
    %c0_94 = arith.constant 0 : index
    %204 = vector.load %arg3[%c0_93, %c0_94] : memref<128x128xf32, #tpu.memory_space<vmem>>, vector<128x128xf32>
    %cst_95 = arith.constant dense<0.000000e+00> : vector<64x128xf32>
    %205 = tpu.matmul %203, %204, %cst_95 {dimension_numbers = #tpu.dot_dimension_numbers<[1], [0], [0], [1], [0, 0, 1, 1], [], []>} : vector<64x128xf32>, vector<128x128xf32>, vector<64x128xf32> -> vector<64x128xf32>
    %c0_96 = arith.constant 0 : index
    %c0_97 = arith.constant 0 : index
    %206 = vector.load %arg4[%c0_96, %c0_97] : memref<1x128xf32, #tpu.memory_space<vmem>>, vector<1x128xf32>
    %207 = vector.broadcast %206 : vector<1x128xf32> to vector<64x128xf32>
    %208 = arith.addf %205, %207 : vector<64x128xf32>
    %209 = vector.shape_cast %208 : vector<64x128xf32> to vector<8x8x128xf32>
    %c0_98 = arith.constant 0 : index
    %c0_99 = arith.constant 0 : index
    %c0_100 = arith.constant 0 : index
    %210 = vector.load %arg5[%c0_98, %c0_99, %c0_100] : memref<8x8x128xf32, #tpu.memory_space<vmem>>, vector<8x8x128xf32>
    tpu.vector_store %arg5[%c0_98, %c0_99, %c0_100], %209 {strides = array<i32>} : memref<8x8x128xf32, #tpu.memory_space<vmem>>, vector<8x8x128xf32>,
    %cst_101 = arith.constant 0.000000e+00 : f32
    %211 = vector.broadcast %cst_101 : f32 to vector<8x128xf32>
    %c0_i32_102 = arith.constant 0 : i32
    %212 = arith.index_cast %c0_i32_102 : i32 to index
    %c0_103 = arith.constant 0 : index
    %c0_104 = arith.constant 0 : index
    %213 = vector.load %arg5[%212, %c0_103, %c0_104] : memref<8x8x128xf32, #tpu.memory_space<vmem>>, vector<1x8x128xf32>
    %214 = vector.shape_cast %213 : vector<1x8x128xf32> to vector<8x128xf32>
    %cst_105 = arith.constant 0.606530666 : f32
    %215 = vector.broadcast %cst_105 : f32 to vector<8x128xf32>
    %216 = arith.mulf %215, %211 : vector<8x128xf32>
    %217 = arith.addf %216, %214 : vector<8x128xf32>
    %cst_106 = arith.constant 0.818730771 : f32
    %218 = vector.broadcast %cst_106 : f32 to vector<8x128xf32>
    %219 = arith.mulf %218, %211 : vector<8x128xf32>
    %cst_107 = arith.constant 0.181269243 : f32
    %220 = vector.broadcast %cst_107 : f32 to vector<8x128xf32>
    %221 = arith.mulf %220, %211 : vector<8x128xf32>
    %222 = arith.addf %219, %221 : vector<8x128xf32>
    %223 = arith.index_cast %c0_i32_102 : i32 to index
    %c0_108 = arith.constant 0 : index
    %c0_109 = arith.constant 0 : index
    %224 = vector.load %arg5[%223, %c0_108, %c0_109] : memref<8x8x128xf32, #tpu.memory_space<vmem>>, vector<1x8x128xf32>
    %225 = vector.shape_cast %224 : vector<1x8x128xf32> to vector<8x128xf32>
    %226 = vector.shape_cast %222 : vector<8x128xf32> to vector<1x8x128xf32>
    tpu.vector_store %arg5[%223, %c0_108, %c0_109], %226 {strides = array<i32>} : memref<8x8x128xf32, #tpu.memory_space<vmem>>, vector<1x8x128xf32>,
    %c1_i32_110 = arith.constant 1 : i32
    %227 = arith.index_cast %c1_i32_110 : i32 to index
    %c0_111 = arith.constant 0 : index
    %c0_112 = arith.constant 0 : index
    %228 = vector.load %arg5[%227, %c0_111, %c0_112] : memref<8x8x128xf32, #tpu.memory_space<vmem>>, vector<1x8x128xf32>
    %229 = vector.shape_cast %228 : vector<1x8x128xf32> to vector<8x128xf32>
    %cst_113 = arith.constant 0.606530666 : f32
    %230 = vector.broadcast %cst_113 : f32 to vector<8x128xf32>
    %231 = arith.mulf %230, %217 : vector<8x128xf32>
    %232 = arith.addf %231, %229 : vector<8x128xf32>
    %cst_114 = arith.constant 0.818730771 : f32
    %233 = vector.broadcast %cst_114 : f32 to vector<8x128xf32>
    %234 = arith.mulf %233, %222 : vector<8x128xf32>
    %cst_115 = arith.constant 0.181269243 : f32
    %235 = vector.broadcast %cst_115 : f32 to vector<8x128xf32>
    %236 = arith.mulf %235, %217 : vector<8x128xf32>
    %237 = arith.addf %234, %236 : vector<8x128xf32>
    %238 = arith.index_cast %c1_i32_110 : i32 to index
    %c0_116 = arith.constant 0 : index
    %c0_117 = arith.constant 0 : index
    %239 = vector.load %arg5[%238, %c0_116, %c0_117] : memref<8x8x128xf32, #tpu.memory_space<vmem>>, vector<1x8x128xf32>
    %240 = vector.shape_cast %239 : vector<1x8x128xf32> to vector<8x128xf32>
    %241 = vector.shape_cast %237 : vector<8x128xf32> to vector<1x8x128xf32>
    tpu.vector_store %arg5[%238, %c0_116, %c0_117], %241 {strides = array<i32>} : memref<8x8x128xf32, #tpu.memory_space<vmem>>, vector<1x8x128xf32>,
    %c2_i32_118 = arith.constant 2 : i32
    %242 = arith.index_cast %c2_i32_118 : i32 to index
    %c0_119 = arith.constant 0 : index
    %c0_120 = arith.constant 0 : index
    %243 = vector.load %arg5[%242, %c0_119, %c0_120] : memref<8x8x128xf32, #tpu.memory_space<vmem>>, vector<1x8x128xf32>
    %244 = vector.shape_cast %243 : vector<1x8x128xf32> to vector<8x128xf32>
    %cst_121 = arith.constant 0.606530666 : f32
    %245 = vector.broadcast %cst_121 : f32 to vector<8x128xf32>
    %246 = arith.mulf %245, %232 : vector<8x128xf32>
    %247 = arith.addf %246, %244 : vector<8x128xf32>
    %cst_122 = arith.constant 0.818730771 : f32
    %248 = vector.broadcast %cst_122 : f32 to vector<8x128xf32>
    %249 = arith.mulf %248, %237 : vector<8x128xf32>
    %cst_123 = arith.constant 0.181269243 : f32
    %250 = vector.broadcast %cst_123 : f32 to vector<8x128xf32>
    %251 = arith.mulf %250, %232 : vector<8x128xf32>
    %252 = arith.addf %249, %251 : vector<8x128xf32>
    %253 = arith.index_cast %c2_i32_118 : i32 to index
    %c0_124 = arith.constant 0 : index
    %c0_125 = arith.constant 0 : index
    %254 = vector.load %arg5[%253, %c0_124, %c0_125] : memref<8x8x128xf32, #tpu.memory_space<vmem>>, vector<1x8x128xf32>
    %255 = vector.shape_cast %254 : vector<1x8x128xf32> to vector<8x128xf32>
    %256 = vector.shape_cast %252 : vector<8x128xf32> to vector<1x8x128xf32>
    tpu.vector_store %arg5[%253, %c0_124, %c0_125], %256 {strides = array<i32>} : memref<8x8x128xf32, #tpu.memory_space<vmem>>, vector<1x8x128xf32>,
    %c3_i32_126 = arith.constant 3 : i32
    %257 = arith.index_cast %c3_i32_126 : i32 to index
    %c0_127 = arith.constant 0 : index
    %c0_128 = arith.constant 0 : index
    %258 = vector.load %arg5[%257, %c0_127, %c0_128] : memref<8x8x128xf32, #tpu.memory_space<vmem>>, vector<1x8x128xf32>
    %259 = vector.shape_cast %258 : vector<1x8x128xf32> to vector<8x128xf32>
    %cst_129 = arith.constant 0.606530666 : f32
    %260 = vector.broadcast %cst_129 : f32 to vector<8x128xf32>
    %261 = arith.mulf %260, %247 : vector<8x128xf32>
    %262 = arith.addf %261, %259 : vector<8x128xf32>
    %cst_130 = arith.constant 0.818730771 : f32
    %263 = vector.broadcast %cst_130 : f32 to vector<8x128xf32>
    %264 = arith.mulf %263, %252 : vector<8x128xf32>
    %cst_131 = arith.constant 0.181269243 : f32
    %265 = vector.broadcast %cst_131 : f32 to vector<8x128xf32>
    %266 = arith.mulf %265, %247 : vector<8x128xf32>
    %267 = arith.addf %264, %266 : vector<8x128xf32>
    %268 = arith.index_cast %c3_i32_126 : i32 to index
    %c0_132 = arith.constant 0 : index
    %c0_133 = arith.constant 0 : index
    %269 = vector.load %arg5[%268, %c0_132, %c0_133] : memref<8x8x128xf32, #tpu.memory_space<vmem>>, vector<1x8x128xf32>
    %270 = vector.shape_cast %269 : vector<1x8x128xf32> to vector<8x128xf32>
    %271 = vector.shape_cast %267 : vector<8x128xf32> to vector<1x8x128xf32>
    tpu.vector_store %arg5[%268, %c0_132, %c0_133], %271 {strides = array<i32>} : memref<8x8x128xf32, #tpu.memory_space<vmem>>, vector<1x8x128xf32>,
    %c4_i32_134 = arith.constant 4 : i32
    %272 = arith.index_cast %c4_i32_134 : i32 to index
    %c0_135 = arith.constant 0 : index
    %c0_136 = arith.constant 0 : index
    %273 = vector.load %arg5[%272, %c0_135, %c0_136] : memref<8x8x128xf32, #tpu.memory_space<vmem>>, vector<1x8x128xf32>
    %274 = vector.shape_cast %273 : vector<1x8x128xf32> to vector<8x128xf32>
    %cst_137 = arith.constant 0.606530666 : f32
    %275 = vector.broadcast %cst_137 : f32 to vector<8x128xf32>
    %276 = arith.mulf %275, %262 : vector<8x128xf32>
    %277 = arith.addf %276, %274 : vector<8x128xf32>
    %cst_138 = arith.constant 0.818730771 : f32
    %278 = vector.broadcast %cst_138 : f32 to vector<8x128xf32>
    %279 = arith.mulf %278, %267 : vector<8x128xf32>
    %cst_139 = arith.constant 0.181269243 : f32
    %280 = vector.broadcast %cst_139 : f32 to vector<8x128xf32>
    %281 = arith.mulf %280, %262 : vector<8x128xf32>
    %282 = arith.addf %279, %281 : vector<8x128xf32>
    %283 = arith.index_cast %c4_i32_134 : i32 to index
    %c0_140 = arith.constant 0 : index
    %c0_141 = arith.constant 0 : index
    %284 = vector.load %arg5[%283, %c0_140, %c0_141] : memref<8x8x128xf32, #tpu.memory_space<vmem>>, vector<1x8x128xf32>
    %285 = vector.shape_cast %284 : vector<1x8x128xf32> to vector<8x128xf32>
    %286 = vector.shape_cast %282 : vector<8x128xf32> to vector<1x8x128xf32>
    tpu.vector_store %arg5[%283, %c0_140, %c0_141], %286 {strides = array<i32>} : memref<8x8x128xf32, #tpu.memory_space<vmem>>, vector<1x8x128xf32>,
    %c5_i32_142 = arith.constant 5 : i32
    %287 = arith.index_cast %c5_i32_142 : i32 to index
    %c0_143 = arith.constant 0 : index
    %c0_144 = arith.constant 0 : index
    %288 = vector.load %arg5[%287, %c0_143, %c0_144] : memref<8x8x128xf32, #tpu.memory_space<vmem>>, vector<1x8x128xf32>
    %289 = vector.shape_cast %288 : vector<1x8x128xf32> to vector<8x128xf32>
    %cst_145 = arith.constant 0.606530666 : f32
    %290 = vector.broadcast %cst_145 : f32 to vector<8x128xf32>
    %291 = arith.mulf %290, %277 : vector<8x128xf32>
    %292 = arith.addf %291, %289 : vector<8x128xf32>
    %cst_146 = arith.constant 0.818730771 : f32
    %293 = vector.broadcast %cst_146 : f32 to vector<8x128xf32>
    %294 = arith.mulf %293, %282 : vector<8x128xf32>
    %cst_147 = arith.constant 0.181269243 : f32
    %295 = vector.broadcast %cst_147 : f32 to vector<8x128xf32>
    %296 = arith.mulf %295, %277 : vector<8x128xf32>
    %297 = arith.addf %294, %296 : vector<8x128xf32>
    %298 = arith.index_cast %c5_i32_142 : i32 to index
    %c0_148 = arith.constant 0 : index
    %c0_149 = arith.constant 0 : index
    %299 = vector.load %arg5[%298, %c0_148, %c0_149] : memref<8x8x128xf32, #tpu.memory_space<vmem>>, vector<1x8x128xf32>
    %300 = vector.shape_cast %299 : vector<1x8x128xf32> to vector<8x128xf32>
    %301 = vector.shape_cast %297 : vector<8x128xf32> to vector<1x8x128xf32>
    tpu.vector_store %arg5[%298, %c0_148, %c0_149], %301 {strides = array<i32>} : memref<8x8x128xf32, #tpu.memory_space<vmem>>, vector<1x8x128xf32>,
    %c6_i32_150 = arith.constant 6 : i32
    %302 = arith.index_cast %c6_i32_150 : i32 to index
    %c0_151 = arith.constant 0 : index
    %c0_152 = arith.constant 0 : index
    %303 = vector.load %arg5[%302, %c0_151, %c0_152] : memref<8x8x128xf32, #tpu.memory_space<vmem>>, vector<1x8x128xf32>
    %304 = vector.shape_cast %303 : vector<1x8x128xf32> to vector<8x128xf32>
    %cst_153 = arith.constant 0.606530666 : f32
    %305 = vector.broadcast %cst_153 : f32 to vector<8x128xf32>
    %306 = arith.mulf %305, %292 : vector<8x128xf32>
    %307 = arith.addf %306, %304 : vector<8x128xf32>
    %cst_154 = arith.constant 0.818730771 : f32
    %308 = vector.broadcast %cst_154 : f32 to vector<8x128xf32>
    %309 = arith.mulf %308, %297 : vector<8x128xf32>
    %cst_155 = arith.constant 0.181269243 : f32
    %310 = vector.broadcast %cst_155 : f32 to vector<8x128xf32>
    %311 = arith.mulf %310, %292 : vector<8x128xf32>
    %312 = arith.addf %309, %311 : vector<8x128xf32>
    %313 = arith.index_cast %c6_i32_150 : i32 to index
    %c0_156 = arith.constant 0 : index
    %c0_157 = arith.constant 0 : index
    %314 = vector.load %arg5[%313, %c0_156, %c0_157] : memref<8x8x128xf32, #tpu.memory_space<vmem>>, vector<1x8x128xf32>
    %315 = vector.shape_cast %314 : vector<1x8x128xf32> to vector<8x128xf32>
    %316 = vector.shape_cast %312 : vector<8x128xf32> to vector<1x8x128xf32>
    tpu.vector_store %arg5[%313, %c0_156, %c0_157], %316 {strides = array<i32>} : memref<8x8x128xf32, #tpu.memory_space<vmem>>, vector<1x8x128xf32>,
    %c7_i32_158 = arith.constant 7 : i32
    %317 = arith.index_cast %c7_i32_158 : i32 to index
    %c0_159 = arith.constant 0 : index
    %c0_160 = arith.constant 0 : index
    %318 = vector.load %arg5[%317, %c0_159, %c0_160] : memref<8x8x128xf32, #tpu.memory_space<vmem>>, vector<1x8x128xf32>
    %319 = vector.shape_cast %318 : vector<1x8x128xf32> to vector<8x128xf32>
    %cst_161 = arith.constant 0.606530666 : f32
    %320 = vector.broadcast %cst_161 : f32 to vector<8x128xf32>
    %321 = arith.mulf %320, %307 : vector<8x128xf32>
    %322 = arith.addf %321, %319 : vector<8x128xf32>
    %cst_162 = arith.constant 0.818730771 : f32
    %323 = vector.broadcast %cst_162 : f32 to vector<8x128xf32>
    %324 = arith.mulf %323, %312 : vector<8x128xf32>
    %cst_163 = arith.constant 0.181269243 : f32
    %325 = vector.broadcast %cst_163 : f32 to vector<8x128xf32>
    %326 = arith.mulf %325, %307 : vector<8x128xf32>
    %327 = arith.addf %324, %326 : vector<8x128xf32>
    %328 = arith.index_cast %c7_i32_158 : i32 to index
    %c0_164 = arith.constant 0 : index
    %c0_165 = arith.constant 0 : index
    %329 = vector.load %arg5[%328, %c0_164, %c0_165] : memref<8x8x128xf32, #tpu.memory_space<vmem>>, vector<1x8x128xf32>
    %330 = vector.shape_cast %329 : vector<1x8x128xf32> to vector<8x128xf32>
    %331 = vector.shape_cast %327 : vector<8x128xf32> to vector<1x8x128xf32>
    tpu.vector_store %arg5[%328, %c0_164, %c0_165], %331 {strides = array<i32>} : memref<8x8x128xf32, #tpu.memory_space<vmem>>, vector<1x8x128xf32>,
    %c8_i32_166 = arith.constant 8 : i32
    return
  }
}

</mosaic_0001>

<bundles_post_ra>
// kernel: tpu_custom_call.1
= control target key start
LH: loop header
LB: loop body
LE: loop exit
PB: predicated region body
PF: predicated region fallthrough
CT: control target
= control target key end

     0   :  { %10 = vsyncpa [#allocation4], 0  ;;  %s968_s0 = inlined_call_operand.hbm [shape: f32[8,8,128], index: 0, kind: input, shape index: {}]   ;;  %s969_s1 = inlined_call_operand.hbm [shape: f32[128,128], index: 1, kind: input, shape index: {}]   ;;  %s970_s2 = inlined_call_operand.vmem [shape: f32[1,128], index: 2, kind: input, shape index: {}]   ;;  %s971_s3 = inlined_call_operand.hbm [shape: f32[128,128], index: 3, kind: input, shape index: {}]   ;;  %s972_s4 = inlined_call_operand.vmem [shape: f32[1,128], index: 4, kind: input, shape index: {}]   ;;  %s973_s5 = inlined_call_operand.hbm [shape: f32[8,8,128], index: 5, kind: output, shape index: {}]  }
   0x1   :  { %11 = vsyncpa [#allocation7], 0 }
   0x2   :  { %12 = vsyncpa [#allocation5], 0  ;;  %s842_s18 = smov [#allocation6]   ;;  %s843_s20 = smov [#allocation3]  }
   0x3   :  { %s30_s19 = sshll.u32 %s842_s18, 4  ;;  %s18_s21 = sshll.u32 %s843_s20, 4  ;;  %s31_s19 = int_to_ptr.vmem [resolvable:$true] %s30_s19  ;;  %s880_s21 = int_to_ptr.vmem [resolvable:$true] %s18_s21 }
   0x4   :  { %s748_s24 = scalar_lea.hbm %s969_s1, 2048 }
   0x5   :  { %p749_p0 = scmp.ne.s32.totalorder %s969_s1, %s748_s24  ;;  %p752_p1 = scmp.lt.u32.totalorder %s748_s24, %s969_s1 }
   0x7   :  { %p754_p2 = pnand %p752_p1, %p749_p0 }
   0x9   :  { %757 = shalt.err (!%p754_p2)
}
   0xa   :  { %s758_s29 = scalar_lea.vmem %s31_s19, 2048  ;;  %p763_p4 = scmp.lt.s32.totalorder %s31_s19, %s31_s19 }
   0xb   :  { %p759_p3 = scmp.ne.s32.totalorder %s31_s19, %s758_s29  ;;  %p764_p5 = scmp.lt.s32.totalorder %s758_s29, %s758_s29 }
   0xd   :  { %p765_p6 = por %p764_p5, %p763_p4 }
   0xf   :  { %p766_p7 = pnand %p765_p6, %p759_p3 }
  0x11   :  { %769 = shalt.err (!%p766_p7)
}
  0x12   :  { %s844_s30 = smov 128   ;;  %s845_s6 = smov 8  }
  0x13   :  { %36 = dma.hbm_to_vmem [thread:$0]  %s969_s1, 2048, %s31_s19, [#allocation7], %s844_s30, %s844_s30, %s845_s6  }
  0x14   :  { %s770_s11 = scalar_lea.hbm %s968_s0, 1024 }
  0x15   :  { %p771_p8 = scmp.ne.s32.totalorder %s968_s0, %s770_s11  ;;  %p774_p9 = scmp.lt.u32.totalorder %s770_s11, %s968_s0 }
  0x17   :  { %p776_p10 = pnand %p774_p9, %p771_p8 }
  0x19   :  { %779 = shalt.err (!%p776_p10)
}
  0x1a   :  { %s780_s16 = scalar_lea.vmem %s880_s21, 1024  ;;  %p785_p12 = scmp.lt.s32.totalorder %s880_s21, %s880_s21 }
  0x1b   :  { %p781_p11 = scmp.ne.s32.totalorder %s880_s21, %s780_s16  ;;  %p786_p13 = scmp.lt.s32.totalorder %s780_s16, %s780_s16 }
  0x1d   :  { %p787_p0 = por %p786_p13, %p785_p12 }
  0x1f   :  { %p788_p1 = pnand %p787_p0, %p781_p11 }
  0x21   :  { %791 = shalt.err (!%p788_p1)
}
  0x22   :  { %24 = dma.hbm_to_vmem [thread:$0]  %s968_s0, 1024, %s880_s21, [#allocation4], %s844_s30, %s844_s30, %s845_s6  }
  0x23   :  { %s846_s18 = smov [#allocation8]   ;;  %s792_s23 = scalar_lea.hbm %s971_s3, 2048 }
  0x24   :  { %s44_s19 = sshll.u32 %s846_s18, 4  ;;  %p793_p2 = scmp.ne.s32.totalorder %s971_s3, %s792_s23  ;;  %s45_s19 = int_to_ptr.vmem [resolvable:$true] %s44_s19 }
  0x25   :  { %p796_p3 = scmp.lt.u32.totalorder %s792_s23, %s971_s3 }
  0x27   :  { %p798_p4 = pnand %p796_p3, %p793_p2 }
  0x29   :  { %801 = shalt.err (!%p798_p4)
}
  0x2a   :  { %s802_s28 = scalar_lea.vmem %s45_s19, 2048  ;;  %p807_p6 = scmp.lt.s32.totalorder %s45_s19, %s45_s19 }
  0x2b   :  { %p803_p5 = scmp.ne.s32.totalorder %s45_s19, %s802_s28  ;;  %p808_p7 = scmp.lt.s32.totalorder %s802_s28, %s802_s28 }
  0x2d   :  { %p809_p8 = por %p808_p7, %p807_p6 }
  0x2f   :  { %p810_p9 = pnand %p809_p8, %p803_p5 }
  0x31   :  { %813 = shalt.err (!%p810_p9)
}
  0x32   :  { %50 = dma.hbm_to_vmem [thread:$0]  %s971_s3, 2048, %s45_s19, [#allocation7], %s844_s30, %s844_s30, %s845_s6  }
  0x33   :  { %836 = dma.done.wait [#allocation4], 1024  }
  0x34   :  { %837 = vsyncadd [#allocation4], 4294966272 }
  0x35   :  { %838 = dma.done.wait [#allocation7], 4096  }
  0x36   :  { %839 = vsyncadd [#allocation7], 4294963200  ;;  %v70_v0 = vld [vmem:[#allocation6] sm:$0xff]  ;;  %v71_v1 = vld [vmem:[#allocation6 + $0x8] sm:$0xff]  ;;  %v847_v56 = vmov 0.0  }
  0x37   :  { %v72_v2 = vld [vmem:[#allocation6 + $0x10] sm:$0xff]  ;;  %v676_v3 = vpack.c.bf16 %v71_v1, %v70_v0  ;;  %v73_v4 = vld [vmem:[#allocation6 + $0x18] sm:$0xff]  ;;  %v74_v6 = vld [vmem:[#allocation6 + $0x20] sm:$0xff]  ;;  %664 = vmatprep.mubr.f32.mxu1 %v847_v56  ;;  %446 = vst [vmem:[#allocation9] sm:$0xff] %v847_v56 }
  0x38   :  { %v680_v5 = vpack.c.bf16 %v73_v4, %v72_v2  ;;  %v75_v7 = vld [vmem:[#allocation6 + $0x28] sm:$0xff]  ;;  %v62_v9 = vld [vmem:[#allocation3] sm:$0xff]  ;;  %v76_v10 = vld [vmem:[#allocation6 + $0x30] sm:$0xff] }
  0x39   :  { %677 = vmatprep.subr.bf16.mxu0 %v676_v3  ;;  %v684_v8 = vpack.c.bf16 %v75_v7, %v74_v6  ;;  %v77_v11 = vld [vmem:[#allocation6 + $0x38] sm:$0xff]  ;;  %620 = vmatprep.mubr.f32.mxu0 %v62_v9  ;;  %v308_v12 = vld [vmem:[#allocation8] sm:$0xff]  ;;  %v309_v13 = vld [vmem:[#allocation8 + $0x8] sm:$0xff] }
  0x3a   :  { %679 = vmatpush3.bf16.msra.mxu0 %v676_v3  ;;  %v310_v14 = vld [vmem:[#allocation8 + $0x10] sm:$0xff]  ;;  %v688_v15 = vpack.c.bf16 %v77_v11, %v76_v10  ;;  %v78_v16 = vld [vmem:[#allocation6 + $0x40] sm:$0xff]  ;;  %v708_v17 = vpack.c.bf16 %v309_v13, %v308_v12  ;;  %v311_v18 = vld [vmem:[#allocation8 + $0x18] sm:$0xff] }
  0x3b   :  { %681 = vmatprep.subr.bf16.mxu0 %v680_v5  ;;  %v79_v19 = vld [vmem:[#allocation6 + $0x48] sm:$0xff]  ;;  %v712_v20 = vpack.c.bf16 %v311_v18, %v310_v14  ;;  %v312_v21 = vld [vmem:[#allocation8 + $0x20] sm:$0xff]  ;;  %v80_v24 = vld [vmem:[#allocation6 + $0x50] sm:$0xff] }
  0x3c   :  { %v313_v22 = vld [vmem:[#allocation8 + $0x28] sm:$0xff]  ;;  %709 = vmatprep.subr.bf16.mxu1 %v708_v17  ;;  %v692_v23 = vpack.c.bf16 %v79_v19, %v78_v16  ;;  %v81_v26 = vld [vmem:[#allocation6 + $0x58] sm:$0xff]  ;;  %v314_v27 = vld [vmem:[#allocation8 + $0x30] sm:$0xff] }
  0x3d   :  { %711 = vmatpush3.bf16.msra.mxu1 %v708_v17  ;;  %v716_v25 = vpack.c.bf16 %v313_v22, %v312_v21  ;;  %v315_v28 = vld [vmem:[#allocation8 + $0x38] sm:$0xff]  ;;  %v696_v29 = vpack.c.bf16 %v81_v26, %v80_v24  ;;  %v82_v30 = vld [vmem:[#allocation6 + $0x60] sm:$0xff]  ;;  %v83_v32 = vld [vmem:[#allocation6 + $0x68] sm:$0xff] }
  0x3e   :  { %683 = vmatpush3.bf16.msra.mxu0 %v680_v5  ;;  %713 = vmatprep.subr.bf16.mxu1 %v712_v20  ;;  %v720_v31 = vpack.c.bf16 %v315_v28, %v314_v27  ;;  %v316_v33 = vld [vmem:[#allocation8 + $0x40] sm:$0xff]  ;;  %v317_v34 = vld [vmem:[#allocation8 + $0x48] sm:$0xff]  ;;  %v700_v35 = vpack.c.bf16 %v83_v32, %v82_v30  ;;  %v84_v36 = vld [vmem:[#allocation6 + $0x70] sm:$0xff] }
  0x3f   :  { %685 = vmatprep.subr.bf16.mxu0 %v684_v8  ;;  %v724_v37 = vpack.c.bf16 %v317_v34, %v316_v33  ;;  %v85_v38 = vld [vmem:[#allocation6 + $0x78] sm:$0xff]  ;;  %v318_v39 = vld [vmem:[#allocation8 + $0x50] sm:$0xff]  ;;  %v63_v43 = vld [vmem:[#allocation3 + $0x8] sm:$0xff] }
  0x40   :  { %v319_v40 = vld [vmem:[#allocation8 + $0x58] sm:$0xff]  ;;  %v704_v41 = vpack.c.bf16 %v85_v38, %v84_v36  ;;  %v64_v44 = vld [vmem:[#allocation3 + $0x10] sm:$0xff]  ;;  %v66_v46 = vld [vmem:[#allocation3 + $0x20] sm:$0xff] }
  0x41   :  { %715 = vmatpush3.bf16.msra.mxu1 %v712_v20  ;;  %v728_v42 = vpack.c.bf16 %v319_v40, %v318_v39  ;;  %v65_v45 = vld [vmem:[#allocation3 + $0x18] sm:$0xff]  ;;  %v67_v47 = vld [vmem:[#allocation3 + $0x28] sm:$0xff]  ;;  %v68_v48 = vld [vmem:[#allocation3 + $0x30] sm:$0xff] }
  0x42   :  { %687 = vmatpush3.bf16.msra.mxu0 %v684_v8  ;;  %717 = vmatprep.subr.bf16.mxu1 %v716_v25  ;;  %v69_v49 = vld [vmem:[#allocation3 + $0x38] sm:$0xff]  ;;  %v320_v50 = vld [vmem:[#allocation8 + $0x60] sm:$0xff]  ;;  %v321_v51 = vld [vmem:[#allocation8 + $0x68] sm:$0xff]  ;;  %v848_v8 = vmov 1.0  }
  0x43   :  { %689 = vmatprep.subr.bf16.mxu0 %v688_v15  ;;  %v732_v52 = vpack.c.bf16 %v321_v51, %v320_v50  ;;  %v322_v53 = vld [vmem:[#allocation8 + $0x70] sm:$0xff]  ;;  %v323_v54 = vld [vmem:[#allocation8 + $0x78] sm:$0xff]  ;;  %v517_v57 = vld [vmem:[%s970_s2] ss:$0 sm:$0xff] }
  0x44   :  { %v736_v55 = vpack.c.bf16 %v323_v54, %v322_v53 }
  0x45   :  { %719 = vmatpush3.bf16.msra.mxu1 %v716_v25 }
  0x46   :  { %691 = vmatpush3.bf16.msra.mxu0 %v688_v15  ;;  %721 = vmatprep.subr.bf16.mxu1 %v720_v31 }
  0x47   :  { %693 = vmatprep.subr.bf16.mxu0 %v692_v23 }
  0x49   :  { %723 = vmatpush3.bf16.msra.mxu1 %v720_v31 }
  0x4a   :  { %695 = vmatpush3.bf16.msra.mxu0 %v692_v23  ;;  %725 = vmatprep.subr.bf16.mxu1 %v724_v37 }
  0x4b   :  { %697 = vmatprep.subr.bf16.mxu0 %v696_v29 }
  0x4d   :  { %727 = vmatpush3.bf16.msra.mxu1 %v724_v37 }
  0x4e   :  { %699 = vmatpush3.bf16.msra.mxu0 %v696_v29  ;;  %729 = vmatprep.subr.bf16.mxu1 %v728_v42 }
  0x4f   :  { %701 = vmatprep.subr.bf16.mxu0 %v700_v35 }
  0x51   :  { %731 = vmatpush3.bf16.msra.mxu1 %v728_v42 }
  0x52   :  { %703 = vmatpush3.bf16.msra.mxu0 %v700_v35  ;;  %733 = vmatprep.subr.bf16.mxu1 %v732_v52 }
  0x53   :  { %705 = vmatprep.subr.bf16.mxu0 %v704_v41 }
  0x55   :  { %735 = vmatpush3.bf16.msra.mxu1 %v732_v52 }
  0x56   :  { %707 = vmatpush3.bf16.msra.mxu0 %v704_v41  ;;  %737 = vmatprep.subr.bf16.mxu1 %v736_v55 }
  0x59   :  { %621 = vmatmul.mubr.f32.vlgmr.msra.gmra.mrb[0].mxu0 %v63_v43  ;;  %739 = vmatpush3.bf16.msra.mxu1 %v736_v55 }
  0x5a   :  { %623 = vmatprep.mubr.f32.mxu0 %v64_v44 }
  0x5d   :  { %624 = vmatmul.mubr.f32.gmra.mrb[2].mxu0 %v65_v45 }
  0x5e   :  { %626 = vmatprep.mubr.f32.mxu0 %v66_v46 }
  0x61   :  { %627 = vmatmul.mubr.f32.gmra.mrb[4].mxu0 %v67_v47 }
  0x62   :  { %629 = vmatprep.mubr.f32.mxu0 %v68_v48 }
  0x65   :  { %630 = vmatmul.mubr.f32.gmra.mrb[6].mxu0 %v69_v49 }
 0x12c   :  { %v622_v58 = vpop.f32.mrb[0].mxu0 }
 0x12d   :  { %v159_v59 = vpop.f32.mrb[1].mxu0  ;;  %v165_v61 = vadd.f32 %v622_v58, %v517_v57 }
 0x12e   :  { %v160_v60 = vadd.f32 %v517_v57, %v159_v59 }
 0x130   :  { %v215_v62 = vmul.f32 0.60653067, %v160_v60  ;;  %v218_v63 = vmul.f32 0.18126924, %v160_v60  ;;  %v625_v0 = vpop.f32.mrb[2].mxu0 }
 0x131   :  { %v169_v1 = vpop.f32.mrb[3].mxu0  ;;  %v175_v10 = vadd.f32 %v625_v0, %v517_v57 }
 0x132   :  { %v216_v2 = vadd.f32 %v215_v62, %v165_v61  ;;  %v170_v3 = vadd.f32 %v517_v57, %v169_v1  ;;  %v518_v4 = vadd.f32 -1.0, %v218_v63  ;;  %v532_v61 = vld [vmem:[%s972_s4] ss:$0 sm:$0xff]  ;;  %s849_s4 = smov [#allocation9]  }
 0x133   :  { %s504_s8 = sshll.u32 %s849_s4, 4  ;;  %s505_s8 = int_to_ptr.vmem [resolvable:$true] %s504_s8 }
 0x134   :  { %v228_v5 = vmul.f32 0.60653067, %v216_v2  ;;  %vm221_vm0 = vcmp.gt.f32.partialorder %v518_v4, 0.0  ;;  %v628_v6 = vpop.f32.mrb[4].mxu0  ;;  %v231_v13 = vmul.f32 0.18126924, %v216_v2  ;;  %p819_p11 = scmp.lt.s32.totalorder %s505_s8, %s505_s8 }
 0x135   :  { %v519_v7 = vsel %vm221_vm0, 1.0, %v847_v56  ;;  %665 = vmatmul.mubr.msk.f32.vlgmr.msra.gmra.mrb[0].mxu1 %vm221_vm0, %v848_v8  ;;  %v179_v9 = vpop.f32.mrb[5].mxu0  ;;  %v185_v23 = vadd.f32 %v628_v6, %v517_v57  ;;  %s814_s9 = scalar_lea.vmem %s505_s8, 1024 }
 0x136   :  { %v229_v11 = vadd.f32 %v228_v5, %v170_v3  ;;  %v225_v12 = vsub.f32 %v218_v63, %v519_v7  ;;  %v180_v17 = vadd.f32 %v517_v57, %v179_v9  ;;  %p815_p10 = scmp.ne.s32.totalorder %s505_s8, %s814_s9  ;;  %p820_p12 = scmp.lt.s32.totalorder %s814_s9, %s814_s9 }
 0x138   :  { %v241_v14 = vmul.f32 0.60653067, %v229_v11  ;;  %v230_v15 = vmul.f32 0.8187308, %v225_v12  ;;  %v631_v16 = vpop.f32.mrb[6].mxu0  ;;  %p821_p13 = por %p820_p12, %p819_p11 }
 0x139   :  { %v189_v20 = vpop.f32.mrb[7].mxu0  ;;  %v244_v28 = vmul.f32 0.18126924, %v229_v11 }
 0x13a   :  { %v242_v18 = vadd.f32 %v241_v14, %v175_v10  ;;  %v232_v19 = vadd.f32 %v231_v13, %v230_v15  ;;  %v190_v30 = vadd.f32 %v517_v57, %v189_v20  ;;  %p822_p0 = pnand %p821_p13, %p815_p10 }
 0x13c   :  { %v254_v21 = vmul.f32 0.60653067, %v242_v18  ;;  %v520_v22 = vadd.f32 -1.0, %v232_v19  ;;  %v257_v39 = vmul.f32 0.18126924, %v242_v18 }
 0x13e   :  { %v255_v24 = vadd.f32 %v254_v21, %v180_v17  ;;  %vm234_vm1 = vcmp.gt.f32.partialorder %v520_v22, 0.0 }
 0x13f   :  { %v521_v25 = vsel %vm234_vm1, 1.0, %v847_v56  ;;  %667 = vmatprep.mubr.msk.f32.mxu1 %vm234_vm1, %v848_v8 }
 0x140   :  { %v267_v26 = vmul.f32 0.60653067, %v255_v24  ;;  %v238_v27 = vsub.f32 %v232_v19, %v521_v25  ;;  %v270_v44 = vmul.f32 0.18126924, %v255_v24 }
 0x142   :  { %v243_v29 = vmul.f32 0.8187308, %v238_v27  ;;  %v268_v31 = vadd.f32 %v267_v26, %v185_v23 }
 0x144   :  { %v280_v32 = vmul.f32 0.60653067, %v268_v31  ;;  %v245_v33 = vadd.f32 %v244_v28, %v243_v29  ;;  %v283_v51 = vmul.f32 0.18126924, %v268_v31 }
 0x146   :  { %v281_v34 = vadd.f32 %v280_v32, %v190_v30  ;;  %v522_v35 = vadd.f32 -1.0, %v245_v33 }
 0x148   :  { %vm247_vm2 = vcmp.gt.f32.partialorder %v522_v35, 0.0  ;;  %v292_v57 = vmul.f32 0.18126924, %v281_v34 }
 0x149   :  { %v523_v36 = vsel %vm247_vm2, 1.0, %v847_v56  ;;  %668 = vmatmul.mubr.msk.f32.gmra.mrb[2].mxu1 %vm247_vm2, %v848_v8 }
 0x14a   :  { %v251_v37 = vsub.f32 %v245_v33, %v523_v36 }
 0x14c   :  { %v256_v38 = vmul.f32 0.8187308, %v251_v37 }
 0x14e   :  { %v258_v40 = vadd.f32 %v257_v39, %v256_v38 }
 0x150   :  { %v524_v41 = vadd.f32 -1.0, %v258_v40 }
 0x152   :  { %vm260_vm3 = vcmp.gt.f32.partialorder %v524_v41, 0.0 }
 0x153   :  { %v525_v42 = vsel %vm260_vm3, 1.0, %v847_v56  ;;  %670 = vmatprep.mubr.msk.f32.mxu1 %vm260_vm3, %v848_v8 }
 0x154   :  { %v264_v43 = vsub.f32 %v258_v40, %v525_v42 }
 0x156   :  { %v269_v45 = vmul.f32 0.8187308, %v264_v43 }
 0x158   :  { %v271_v46 = vadd.f32 %v270_v44, %v269_v45 }
 0x15a   :  { %v526_v47 = vadd.f32 -1.0, %v271_v46 }
 0x15c   :  { %vm273_vm4 = vcmp.gt.f32.partialorder %v526_v47, 0.0 }
 0x15d   :  { %v527_v48 = vsel %vm273_vm4, 1.0, %v847_v56  ;;  %671 = vmatmul.mubr.msk.f32.gmra.mrb[4].mxu1 %vm273_vm4, %v848_v8 }
 0x15e   :  { %v277_v49 = vsub.f32 %v271_v46, %v527_v48 }
 0x160   :  { %v282_v50 = vmul.f32 0.8187308, %v277_v49 }
 0x162   :  { %v284_v52 = vadd.f32 %v283_v51, %v282_v50 }
 0x164   :  { %v528_v53 = vadd.f32 -1.0, %v284_v52 }
 0x166   :  { %vm286_vm5 = vcmp.gt.f32.partialorder %v528_v53, 0.0 }
 0x167   :  { %v529_v54 = vsel %vm286_vm5, 1.0, %v847_v56  ;;  %673 = vmatprep.mubr.msk.f32.mxu1 %vm286_vm5, %v848_v8 }
 0x168   :  { %v290_v55 = vsub.f32 %v284_v52, %v529_v54 }
 0x16a   :  { %v291_v58 = vmul.f32 0.8187308, %v290_v55 }
 0x16c   :  { %v293_v59 = vadd.f32 %v292_v57, %v291_v58 }
 0x16e   :  { %v530_v60 = vadd.f32 -1.0, %v293_v59 }
 0x170   :  { %vm295_vm6 = vcmp.gt.f32.partialorder %v530_v60, 0.0 }
 0x171   :  { %674 = vmatmul.mubr.msk.f32.gmra.mrb[6].mxu1 %vm295_vm6, %v848_v8 }
 0x208   :  { %v666_v62 = vpop.f32.mrb[0].mxu1 }
 0x209   :  { %v397_v63 = vpop.f32.mrb[1].mxu1  ;;  %v403_v1 = vadd.f32 %v666_v62, %v532_v61 }
 0x20a   :  { %v398_v0 = vadd.f32 %v532_v61, %v397_v63 }
 0x20c   :  { %v449_v2 = vmul.f32 0.60653067, %v398_v0  ;;  %v451_v56 = vmul.f32 0.18126924, %v398_v0 }
 0x20e   :  { %v450_v3 = vadd.f32 %v449_v2, %v403_v1  ;;  %453 = vst [vmem:[#allocation9 + $0x8] sm:$0xff] %v451_v56  ;;  %v458_v4 = vmul.f32 0.8187308, %v451_v56 }
 0x210   :  { %v459_v5 = vmul.f32 0.18126924, %v450_v3  ;;  %v456_v8 = vmul.f32 0.60653067, %v450_v3 }
 0x212   :  { %v460_v6 = vadd.f32 %v459_v5, %v458_v4 }
 0x214   :  { %461 = vst [vmem:[#allocation9 + $0x10] sm:$0xff] %v460_v6  ;;  %v466_v14 = vmul.f32 0.8187308, %v460_v6 }
 0x21c   :  { %v669_v7 = vpop.f32.mrb[2].mxu1 }
 0x21d   :  { %v407_v9 = vpop.f32.mrb[3].mxu1  ;;  %v413_v12 = vadd.f32 %v669_v7, %v532_v61 }
 0x21e   :  { %v408_v10 = vadd.f32 %v532_v61, %v407_v9 }
 0x220   :  { %v457_v11 = vadd.f32 %v456_v8, %v408_v10 }
 0x222   :  { %v464_v13 = vmul.f32 0.60653067, %v457_v11  ;;  %v467_v15 = vmul.f32 0.18126924, %v457_v11 }
 0x224   :  { %v468_v16 = vadd.f32 %v467_v15, %v466_v14  ;;  %v465_v17 = vadd.f32 %v464_v13, %v413_v12 }
 0x226   :  { %469 = vst [vmem:[#allocation9 + $0x18] sm:$0xff] %v468_v16  ;;  %v474_v18 = vmul.f32 0.8187308, %v468_v16  ;;  %v475_v19 = vmul.f32 0.18126924, %v465_v17 }
 0x227   :  { %v472_v24 = vmul.f32 0.60653067, %v465_v17 }
 0x228   :  { %v476_v20 = vadd.f32 %v475_v19, %v474_v18 }
 0x22a   :  { %477 = vst [vmem:[#allocation9 + $0x20] sm:$0xff] %v476_v20  ;;  %v482_v28 = vmul.f32 0.8187308, %v476_v20 }
 0x230   :  { %v672_v21 = vpop.f32.mrb[4].mxu1 }
 0x231   :  { %v417_v22 = vpop.f32.mrb[5].mxu1  ;;  %v423_v26 = vadd.f32 %v672_v21, %v532_v61 }
 0x232   :  { %v418_v23 = vadd.f32 %v532_v61, %v417_v22 }
 0x234   :  { %v473_v25 = vadd.f32 %v472_v24, %v418_v23 }
 0x236   :  { %v480_v27 = vmul.f32 0.60653067, %v473_v25  ;;  %v483_v29 = vmul.f32 0.18126924, %v473_v25 }
 0x238   :  { %v484_v30 = vadd.f32 %v483_v29, %v482_v28  ;;  %v481_v31 = vadd.f32 %v480_v27, %v423_v26 }
 0x23a   :  { %485 = vst [vmem:[#allocation9 + $0x28] sm:$0xff] %v484_v30  ;;  %v490_v32 = vmul.f32 0.8187308, %v484_v30  ;;  %v491_v33 = vmul.f32 0.18126924, %v481_v31 }
 0x23b   :  { %v488_v38 = vmul.f32 0.60653067, %v481_v31 }
 0x23c   :  { %v492_v34 = vadd.f32 %v491_v33, %v490_v32 }
 0x23e   :  { %493 = vst [vmem:[#allocation9 + $0x30] sm:$0xff] %v492_v34  ;;  %v494_v40 = vmul.f32 0.8187308, %v492_v34 }
 0x244   :  { %v675_v35 = vpop.f32.mrb[6].mxu1 }
 0x245   :  { %v427_v36 = vpop.f32.mrb[7].mxu1 }
 0x246   :  { %v428_v37 = vadd.f32 %v532_v61, %v427_v36 }
 0x248   :  { %v489_v39 = vadd.f32 %v488_v38, %v428_v37 }
 0x24a   :  { %v495_v41 = vmul.f32 0.18126924, %v489_v39 }
 0x24c   :  { %v496_v42 = vadd.f32 %v495_v41, %v494_v40 }
 0x24e   :  { %498 = vst [vmem:[#allocation9 + $0x38] sm:$0xff] %v496_v42 }
 0x24f   :  { %825 = shalt.err (!%p822_p0)
}
 0x250   :  { %s826_s12 = scalar_lea.hbm %s973_s5, 1024 }
 0x251   :  { %p827_p1 = scmp.ne.s32.totalorder %s973_s5, %s826_s12  ;;  %p830_p2 = scmp.lt.u32.totalorder %s826_s12, %s973_s5 }
 0x253   :  { %p832_p3 = pnand %p830_p2, %p827_p1 }
 0x255   :  { %835 = shalt.err (!%p832_p3)
}
 0x256   :  { %510 = dma.vmem_to_hbm [thread:$0]  %s505_s8, 1024, %s973_s5, [#allocation5], %s844_s30, %s844_s30, %s845_s6  }
 0x257   :  { %840 = dma.done.wait [#allocation5], 1024  }
 0x258   :  { %841 = vsyncadd [#allocation5], 4294966272 }
 0x259   :  { %514 = vsyncpa [#allocation4], 1 }
 0x25a   :  { %515 = vsyncpa [#allocation7], 1 }
 0x25b   :  { %516 = vsyncpa [#allocation5], 1 }

</bundles_post_ra>
